<compile_context>
chip_gen: v6e
topology: v6e:2x2x1
jax: 0.10.0
libtpu: 0.0.40
codegen_flags: <defaults>
</compile_context>

<pallas_src>
import functools

import jax
import jax.numpy as jnp
from jax import lax
from jax.experimental import pallas as pl
from jax.experimental.pallas import tpu as pltpu

_LANE = 128
_SUBLANE = 8
_MAX_TILE_B = 1024


def _round_up(x, m):
    return (x + m - 1) // m * m


def nextchar_kernel(tokens_ref, m_ref, b1_ref, w2_ref, b2_ref, o_ref, *, vocab_size):
    # tokens_ref: (TB, T)     int32  token ids for this batch tile
    # m_ref     : (TVp, Hp)   bf16   pre-combined emb @ lin1 weight (padded)
    # b1_ref    : (1, Hp)     f32
    # w2_ref    : (Hp, Vp)    bf16
    # b2_ref    : (1, Vp)     f32
    # o_ref     : (TB, Vp)    f32    logits (lane-dense, padded)
    TB, T = tokens_ref.shape
    TVp = m_ref.shape[0]

    tokens = tokens_ref[...]                                     # (TB, T) int32
    lane_ids = lax.broadcasted_iota(jnp.int32, (TB, TVp), 1)     # flat (t, v) lanes

    # One lane-dense one-hot slab over the flattened (t, v) axis.  Targets for
    # different t live in disjoint lane ranges [t*V, (t+1)*V), so OR == sum.
    hit = lane_ids == tokens[:, 0:1]
    for t in range(1, T):  # T is small & static; pure full-width VPU compares
        hit = jnp.logical_or(hit, lane_ids == (tokens[:, t:t + 1] + t * vocab_size))
    onehot = hit.astype(jnp.bfloat16)                            # (TB, TVp)

    # Single fused gather+lin1 matmul: K = T*V uses the MXU contraction depth.
    h = jnp.dot(onehot, m_ref[...], preferred_element_type=jnp.float32) + b1_ref[...]
    h = jnp.sin(h)                                               # f32 EUP/VPU

    out = jnp.dot(h.astype(jnp.bfloat16), w2_ref[...],
                  preferred_element_type=jnp.float32) + b2_ref[...]
    o_ref[...] = out.astype(o_ref.dtype)


def nextchar_forward(tokens, emb, w1, b1, w2, b2):
    """Pallas-backed forward matching NextChar.forward semantics.

    tokens: (B, T) int | emb: (V, E) | w1: (T*E, H), b1: (1, H) | w2: (H, V), b2: (1, V)
    (weights stored as (in, out), the transpose of PyTorch nn.Linear layout).
    """
    B, T = tokens.shape
    V, E = emb.shape
    TE, H = w1.shape
    assert TE == T * E
    Vout = w2.shape[1]

    Hp = _round_up(H, _LANE)
    Vp = _round_up(Vout, _LANE)
    TVp = _round_up(T * V, _LANE)

    # ---- Batch tiling -------------------------------------------------------
    Bp = _round_up(B, _SUBLANE)
    if Bp <= _SUBLANE:
        tile_b = Bp
    elif Bp <= 2 * _MAX_TILE_B:
        # Aim for exactly two grid steps so both v7x TensorCores get work.
        tile_b = _round_up(pl.cdiv(Bp, 2), _SUBLANE)
    else:
        tile_b = _MAX_TILE_B
    Bp = _round_up(Bp, tile_b)
    grid_b = Bp // tile_b

    # ---- Parameter prep (wrapper-side; in a real model, fold into the ckpt) --
    tokens_p = jnp.zeros((Bp, T), jnp.int32).at[:B].set(tokens.astype(jnp.int32))

    # Pre-combine embedding with lin1:  M[t*V + v, h] = sum_e emb[v, e] * w1[t*E + e, h]
    m_full = jnp.einsum(
        "ve,teh->tvh",
        emb.astype(jnp.float32),
        w1.reshape(T, E, H).astype(jnp.float32),
    ).reshape(T * V, H)
    m_p = jnp.zeros((TVp, Hp), jnp.bfloat16).at[:T * V, :H].set(
        m_full.astype(jnp.bfloat16))

    b1_p = jnp.zeros((1, Hp), jnp.float32).at[:, :H].set(
        b1.reshape(1, H).astype(jnp.float32))
    w2_p = jnp.zeros((Hp, Vp), jnp.bfloat16).at[:H, :Vout].set(w2.astype(jnp.bfloat16))
    b2_p = jnp.zeros((1, Vp), jnp.float32).at[:, :Vout].set(
        b2.reshape(1, Vout).astype(jnp.float32))

    flops = 2 * Bp * (TVp * Hp + Hp * Vp)
    bytes_accessed = (4 * Bp * T + 2 * TVp * Hp + 4 * Hp
                      + 2 * Hp * Vp + 4 * Vp + 4 * Bp * Vp)
    cost = pl.CostEstimate(flops=flops, transcendentals=Bp * Hp,
                           bytes_accessed=bytes_accessed)

    kernel = functools.partial(nextchar_kernel, vocab_size=V)

    out_p = pl.pallas_call(
        kernel,
        out_shape=jax.ShapeDtypeStruct((Bp, Vp), jnp.float32),
        grid=(grid_b,),
        in_specs=[
            pl.BlockSpec((tile_b, T), lambda i: (i, 0)),       # tokens
            pl.BlockSpec((TVp, Hp), lambda i: (0, 0)),         # combined emb@lin1
            pl.BlockSpec((1, Hp), lambda i: (0, 0)),           # b1
            pl.BlockSpec((Hp, Vp), lambda i: (0, 0)),          # w2
            pl.BlockSpec((1, Vp), lambda i: (0, 0)),           # b2
        ],
        out_specs=pl.BlockSpec((tile_b, Vp), lambda i: (i, 0)),
        compiler_params=pltpu.CompilerParams(
            dimension_semantics=("parallel",),
            vmem_limit_bytes=32 * 1024 * 1024,
        ),
        cost_estimate=cost,
    )(tokens_p, m_p, b1_p, w2_p, b2_p)

    return out_p[:B, :Vout]


def nextchar_reference(tokens, emb, w1, b1, w2, b2):
    B = tokens.shape[0]
    x = jnp.take(emb, tokens, axis=0).reshape(B, -1).astype(jnp.float32)
    h = jnp.sin(x @ w1 + b1.reshape(1, -1))
    return h @ w2 + b2.reshape(1, -1)


if __name__ == "__main__":
    # Small shapes consistent with the module (block_size=10 from the script).
    block_size = 10
    vocab_size = 32
    emb_dim = 8
    hidden_size = 32
    batch = 2

    key = jax.random.PRNGKey(0)
    k_tok, k_emb, k_w1, k_b1, k_w2, k_b2 = jax.random.split(key, 6)

    tokens = jax.random.randint(k_tok, (batch, block_size), 0, vocab_size,
                                dtype=jnp.int32)
    emb = jax.random.normal(k_emb, (vocab_size, emb_dim), dtype=jnp.float32)
    in1 = block_size * emb_dim
    lim1 = 1.0 / float(in1) ** 0.5
    w1 = jax.random.uniform(k_w1, (in1, hidden_size), jnp.float32, -lim1, lim1)
    b1 = jax.random.uniform(k_b1, (1, hidden_size), jnp.float32, -lim1, lim1)
    lim2 = 1.0 / float(hidden_size) ** 0.5
    w2 = jax.random.uniform(k_w2, (hidden_size, vocab_size), jnp.float32, -lim2, lim2)
    b2 = jax.random.uniform(k_b2, (1, vocab_size), jnp.float32, -lim2, lim2)

    out = nextchar_forward(tokens, emb, w1, b1, w2, b2)
    out = jax.block_until_ready(out)

    ref = nextchar_reference(tokens, emb, w1, b1, w2, b2)
    assert out.shape == (batch, vocab_size)
    # bf16 MXU inputs (pre-combined emb@lin1 and w2) with f32 accumulation ->
    # loosened tolerance vs the pure-f32 reference.
    assert jnp.allclose(out, ref, atol=5e-2, rtol=5e-2), "Pallas output mismatch vs reference"

    print("KERNEL_OK")
</pallas_src>

<mosaic_0001>
module attributes {stable_mosaic.version = 11 : i64} {
  func.func @nextchar_kernel(%arg0: i32, %arg1: memref<8x10xi32, #tpu.memory_space<vmem>>, %arg2: memref<384x128xbf16, #tpu.memory_space<vmem>>, %arg3: memref<1x128xf32, #tpu.memory_space<vmem>>, %arg4: memref<128x128xbf16, #tpu.memory_space<vmem>>, %arg5: memref<1x128xf32, #tpu.memory_space<vmem>>, %arg6: memref<8x128xf32, #tpu.memory_space<vmem>>) attributes {dimension_semantics = [#tpu.dimension_semantics<parallel>], iteration_bounds = array<i64: 1>, scalar_prefetch = 0 : i64, scratch_operands = 0 : i64, tpu.core_type = #tpu.core_type<tc>, window_params = [{transform_indices = @transform_0, window_bounds = array<i64: 8, 10>}, {pipeline_mode = #tpu.pipeline_mode<synchronous>, transform_indices = @transform_1, window_bounds = array<i64: 384, 128>}, {pipeline_mode = #tpu.pipeline_mode<synchronous>, transform_indices = @transform_2, window_bounds = array<i64: 1, 128>}, {pipeline_mode = #tpu.pipeline_mode<synchronous>, transform_indices = @transform_3, window_bounds = array<i64: 128, 128>}, {pipeline_mode = #tpu.pipeline_mode<synchronous>, transform_indices = @transform_4, window_bounds = array<i64: 1, 128>}, {transform_indices = @transform_5, window_bounds = array<i64: 8, 128>}]} {
    %c0 = arith.constant 0 : index
    %c0_0 = arith.constant 0 : index
    %0 = vector.load %arg1[%c0, %c0_0] : memref<8x10xi32, #tpu.memory_space<vmem>>, vector<8x10xi32>
    %1 = tpu.iota {dimensions = array<i32: 1>} : vector<8x384xi32>
    %2 = vector.extract_strided_slice %0 {offsets = [0, 0], sizes = [8, 1], strides = [1, 1]} : vector<8x10xi32> to vector<8x1xi32>
    %3 = vector.broadcast %2 : vector<8x1xi32> to vector<8x384xi32>
    %4 = arith.cmpi eq, %1, %3 : vector<8x384xi32>
    %5 = vector.extract_strided_slice %0 {offsets = [0, 1], sizes = [8, 1], strides = [1, 1]} : vector<8x10xi32> to vector<8x1xi32>
    %c32_i32 = arith.constant 32 : i32
    %6 = vector.broadcast %c32_i32 : i32 to vector<8x1xi32>
    %7 = arith.addi %5, %6 : vector<8x1xi32>
    %8 = vector.broadcast %7 : vector<8x1xi32> to vector<8x384xi32>
    %9 = arith.cmpi eq, %1, %8 : vector<8x384xi32>
    %10 = arith.ori %4, %9 : vector<8x384xi1>
    %11 = vector.extract_strided_slice %0 {offsets = [0, 2], sizes = [8, 1], strides = [1, 1]} : vector<8x10xi32> to vector<8x1xi32>
    %c64_i32 = arith.constant 64 : i32
    %12 = vector.broadcast %c64_i32 : i32 to vector<8x1xi32>
    %13 = arith.addi %11, %12 : vector<8x1xi32>
    %14 = vector.broadcast %13 : vector<8x1xi32> to vector<8x384xi32>
    %15 = arith.cmpi eq, %1, %14 : vector<8x384xi32>
    %16 = arith.ori %10, %15 : vector<8x384xi1>
    %17 = vector.extract_strided_slice %0 {offsets = [0, 3], sizes = [8, 1], strides = [1, 1]} : vector<8x10xi32> to vector<8x1xi32>
    %c96_i32 = arith.constant 96 : i32
    %18 = vector.broadcast %c96_i32 : i32 to vector<8x1xi32>
    %19 = arith.addi %17, %18 : vector<8x1xi32>
    %20 = vector.broadcast %19 : vector<8x1xi32> to vector<8x384xi32>
    %21 = arith.cmpi eq, %1, %20 : vector<8x384xi32>
    %22 = arith.ori %16, %21 : vector<8x384xi1>
    %23 = vector.extract_strided_slice %0 {offsets = [0, 4], sizes = [8, 1], strides = [1, 1]} : vector<8x10xi32> to vector<8x1xi32>
    %c128_i32 = arith.constant 128 : i32
    %24 = vector.broadcast %c128_i32 : i32 to vector<8x1xi32>
    %25 = arith.addi %23, %24 : vector<8x1xi32>
    %26 = vector.broadcast %25 : vector<8x1xi32> to vector<8x384xi32>
    %27 = arith.cmpi eq, %1, %26 : vector<8x384xi32>
    %28 = arith.ori %22, %27 : vector<8x384xi1>
    %29 = vector.extract_strided_slice %0 {offsets = [0, 5], sizes = [8, 1], strides = [1, 1]} : vector<8x10xi32> to vector<8x1xi32>
    %c160_i32 = arith.constant 160 : i32
    %30 = vector.broadcast %c160_i32 : i32 to vector<8x1xi32>
    %31 = arith.addi %29, %30 : vector<8x1xi32>
    %32 = vector.broadcast %31 : vector<8x1xi32> to vector<8x384xi32>
    %33 = arith.cmpi eq, %1, %32 : vector<8x384xi32>
    %34 = arith.ori %28, %33 : vector<8x384xi1>
    %35 = vector.extract_strided_slice %0 {offsets = [0, 6], sizes = [8, 1], strides = [1, 1]} : vector<8x10xi32> to vector<8x1xi32>
    %c192_i32 = arith.constant 192 : i32
    %36 = vector.broadcast %c192_i32 : i32 to vector<8x1xi32>
    %37 = arith.addi %35, %36 : vector<8x1xi32>
    %38 = vector.broadcast %37 : vector<8x1xi32> to vector<8x384xi32>
    %39 = arith.cmpi eq, %1, %38 : vector<8x384xi32>
    %40 = arith.ori %34, %39 : vector<8x384xi1>
    %41 = vector.extract_strided_slice %0 {offsets = [0, 7], sizes = [8, 1], strides = [1, 1]} : vector<8x10xi32> to vector<8x1xi32>
    %c224_i32 = arith.constant 224 : i32
    %42 = vector.broadcast %c224_i32 : i32 to vector<8x1xi32>
    %43 = arith.addi %41, %42 : vector<8x1xi32>
    %44 = vector.broadcast %43 : vector<8x1xi32> to vector<8x384xi32>
    %45 = arith.cmpi eq, %1, %44 : vector<8x384xi32>
    %46 = arith.ori %40, %45 : vector<8x384xi1>
    %47 = vector.extract_strided_slice %0 {offsets = [0, 8], sizes = [8, 1], strides = [1, 1]} : vector<8x10xi32> to vector<8x1xi32>
    %c256_i32 = arith.constant 256 : i32
    %48 = vector.broadcast %c256_i32 : i32 to vector<8x1xi32>
    %49 = arith.addi %47, %48 : vector<8x1xi32>
    %50 = vector.broadcast %49 : vector<8x1xi32> to vector<8x384xi32>
    %51 = arith.cmpi eq, %1, %50 : vector<8x384xi32>
    %52 = arith.ori %46, %51 : vector<8x384xi1>
    %53 = vector.extract_strided_slice %0 {offsets = [0, 9], sizes = [8, 1], strides = [1, 1]} : vector<8x10xi32> to vector<8x1xi32>
    %c288_i32 = arith.constant 288 : i32
    %54 = vector.broadcast %c288_i32 : i32 to vector<8x1xi32>
    %55 = arith.addi %53, %54 : vector<8x1xi32>
    %56 = vector.broadcast %55 : vector<8x1xi32> to vector<8x384xi32>
    %57 = arith.cmpi eq, %1, %56 : vector<8x384xi32>
    %58 = arith.ori %52, %57 : vector<8x384xi1>
    %59 = arith.extui %58 : vector<8x384xi1> to vector<8x384xi32>
    %60 = arith.sitofp %59 : vector<8x384xi32> to vector<8x384xf32>
    %61 = arith.truncf %60 : vector<8x384xf32> to vector<8x384xbf16>
    %c0_1 = arith.constant 0 : index
    %c0_2 = arith.constant 0 : index
    %62 = vector.load %arg2[%c0_1, %c0_2] : memref<384x128xbf16, #tpu.memory_space<vmem>>, vector<384x128xbf16>
    %cst = arith.constant dense<0.000000e+00> : vector<8x128xf32>
    %63 = tpu.matmul %61, %62, %cst {dimension_numbers = #tpu.dot_dimension_numbers<[1], [0], [0], [1], [0, 0, 1, 1], [], []>} : vector<8x384xbf16>, vector<384x128xbf16>, vector<8x128xf32> -> vector<8x128xf32>
    %c0_3 = arith.constant 0 : index
    %c0_4 = arith.constant 0 : index
    %64 = vector.load %arg3[%c0_3, %c0_4] : memref<1x128xf32, #tpu.memory_space<vmem>>, vector<1x128xf32>
    %65 = vector.broadcast %64 : vector<1x128xf32> to vector<8x128xf32>
    %66 = arith.addf %63, %65 : vector<8x128xf32>
    %67 = math.sin %66 : vector<8x128xf32>
    %68 = arith.truncf %67 : vector<8x128xf32> to vector<8x128xbf16>
    %c0_5 = arith.constant 0 : index
    %c0_6 = arith.constant 0 : index
    %69 = vector.load %arg4[%c0_5, %c0_6] : memref<128x128xbf16, #tpu.memory_space<vmem>>, vector<128x128xbf16>
    %cst_7 = arith.constant dense<0.000000e+00> : vector<8x128xf32>
    %70 = tpu.matmul %68, %69, %cst_7 {dimension_numbers = #tpu.dot_dimension_numbers<[1], [0], [0], [1], [0, 0, 1, 1], [], []>} : vector<8x128xbf16>, vector<128x128xbf16>, vector<8x128xf32> -> vector<8x128xf32>
    %c0_8 = arith.constant 0 : index
    %c0_9 = arith.constant 0 : index
    %71 = vector.load %arg5[%c0_8, %c0_9] : memref<1x128xf32, #tpu.memory_space<vmem>>, vector<1x128xf32>
    %72 = vector.broadcast %71 : vector<1x128xf32> to vector<8x128xf32>
    %73 = arith.addf %70, %72 : vector<8x128xf32>
    %c0_10 = arith.constant 0 : index
    %c0_11 = arith.constant 0 : index
    %74 = vector.load %arg6[%c0_10, %c0_11] : memref<8x128xf32, #tpu.memory_space<vmem>>, vector<8x128xf32>
    tpu.vector_store %arg6[%c0_10, %c0_11], %73 {strides = array<i32>} : memref<8x128xf32, #tpu.memory_space<vmem>>, vector<8x128xf32>,
    return
  }
  func.func @transform_0(%arg0: i32) -> (i32, i32) {
    %c0_i32 = arith.constant 0 : i32
    %c0_i32_0 = arith.constant 0 : i32
    return %arg0, %c0_i32 : i32, i32
  }
  func.func @transform_1(%arg0: i32) -> (i32, i32) {
    %c0_i32 = arith.constant 0 : i32
    %c0_i32_0 = arith.constant 0 : i32
    %c0_i32_1 = arith.constant 0 : i32
    return %c0_i32, %c0_i32_0 : i32, i32
  }
  func.func @transform_2(%arg0: i32) -> (i32, i32) {
    %c0_i32 = arith.constant 0 : i32
    %c0_i32_0 = arith.constant 0 : i32
    %c0_i32_1 = arith.constant 0 : i32
    return %c0_i32, %c0_i32_0 : i32, i32
  }
  func.func @transform_3(%arg0: i32) -> (i32, i32) {
    %c0_i32 = arith.constant 0 : i32
    %c0_i32_0 = arith.constant 0 : i32
    %c0_i32_1 = arith.constant 0 : i32
    return %c0_i32, %c0_i32_0 : i32, i32
  }
  func.func @transform_4(%arg0: i32) -> (i32, i32) {
    %c0_i32 = arith.constant 0 : i32
    %c0_i32_0 = arith.constant 0 : i32
    %c0_i32_1 = arith.constant 0 : i32
    return %c0_i32, %c0_i32_0 : i32, i32
  }
  func.func @transform_5(%arg0: i32) -> (i32, i32) {
    %c0_i32 = arith.constant 0 : i32
    %c0_i32_0 = arith.constant 0 : i32
    return %arg0, %c0_i32 : i32, i32
  }
}

</mosaic_0001>

<bundles_post_ra>
// kernel: tpu_custom_call.1
= control target key start
LH: loop header
LB: loop body
LE: loop exit
PB: predicated region body
PF: predicated region fallthrough
CT: control target
= control target key end

     0   :  { %10 = vsyncpa [#allocation3], 0  ;;  %s1125_s0 = inlined_call_operand.hbm [shape: s32[8,10], index: 0, kind: input, shape index: {}]   ;;  %s1126_s1 = inlined_call_operand.hbm [shape: bf16[384,128], index: 1, kind: input, shape index: {}]   ;;  %s1127_s2 = inlined_call_operand.vmem [shape: f32[1,128], index: 2, kind: input, shape index: {}]   ;;  %s1128_s3 = inlined_call_operand.hbm [shape: bf16[128,128], index: 3, kind: input, shape index: {}]   ;;  %s1129_s4 = inlined_call_operand.vmem [shape: f32[1,128], index: 4, kind: input, shape index: {}]   ;;  %s1130_s5 = inlined_call_operand.hbm [shape: f32[8,128], index: 5, kind: output, shape index: {}]  }
   0x1   :  { %11 = vsyncpa [#allocation6], 0 }
   0x2   :  { %12 = vsyncpa [#allocation4], 0  ;;  %s965_s18 = smov [#allocation5]  }
   0x3   :  { %s28_s19 = sshll.u32 %s965_s18, 4  ;;  %s29_s19 = int_to_ptr.vmem [resolvable:$true] %s28_s19 }
   0x4   :  { %s887_s20 = scalar_lea.vmem %s29_s19, 3072  ;;  %p892_p1 = scmp.lt.s32.totalorder %s29_s19, %s29_s19 }
   0x5   :  { %p888_p0 = scmp.ne.s32.totalorder %s29_s19, %s887_s20  ;;  %p893_p2 = scmp.lt.s32.totalorder %s887_s20, %s887_s20 }
   0x7   :  { %p894_p3 = por %p893_p2, %p892_p1 }
   0x9   :  { %p895_p4 = pnand %p894_p3, %p888_p0 }
   0xb   :  { %898 = shalt.err (!%p895_p4)
}
   0xc   :  { %s966_s21 = smov 64   ;;  %s967_s22 = smov 4  }
   0xd   :  { %34 = dma.hbm_to_vmem [thread:$0]  %s1126_s1, 3072, %s29_s19, [#allocation6], %s966_s21, %s966_s21, %s967_s22  }
   0xe   :  { %s968_s25 = smov [#allocation2]   ;;  %s969_s27 = smov [#allocation7]  }
   0xf   :  { %s19_s26 = sshll.u32 %s968_s25, 4  ;;  %s42_s28 = sshll.u32 %s969_s27, 4  ;;  %s20_s26 = int_to_ptr.vmem [resolvable:$true] %s19_s26  ;;  %s43_s28 = int_to_ptr.vmem [resolvable:$true] %s42_s28 }
  0x10   :  { %s907_s29 = scalar_lea.vmem %s20_s26, 128  ;;  %p912_p6 = scmp.lt.s32.totalorder %s20_s26, %s20_s26 }
  0x11   :  { %p908_p5 = scmp.ne.s32.totalorder %s20_s26, %s907_s29  ;;  %p913_p7 = scmp.lt.s32.totalorder %s907_s29, %s907_s29 }
  0x13   :  { %p914_p8 = por %p913_p7, %p912_p6 }
  0x15   :  { %p915_p9 = pnand %p914_p8, %p908_p5 }
  0x17   :  { %918 = shalt.err (!%p915_p9)
}
  0x18   :  { %22 = dma.hbm_to_vmem [thread:$0]  %s1125_s0, 128, %s20_s26, [#allocation3]  }
  0x19   :  { %s927_s7 = scalar_lea.vmem %s43_s28, 1024  ;;  %p932_p11 = scmp.lt.s32.totalorder %s43_s28, %s43_s28 }
  0x1a   :  { %p928_p10 = scmp.ne.s32.totalorder %s43_s28, %s927_s7  ;;  %p933_p12 = scmp.lt.s32.totalorder %s927_s7, %s927_s7 }
  0x1c   :  { %p934_p13 = por %p933_p12, %p932_p11 }
  0x1e   :  { %p935_p0 = pnand %p934_p13, %p928_p10 }
  0x20   :  { %938 = shalt.err (!%p935_p0)
}
  0x21   :  { %48 = dma.hbm_to_vmem [thread:$0]  %s1128_s3, 1024, %s43_s28, [#allocation6], %s966_s21, %s966_s21, %s967_s22  }
  0x22   :  { %959 = dma.done.wait [#allocation3], 128  }
  0x23   :  { %960 = vsyncadd [#allocation3], 4294967168 }
  0x24   :  { %961 = dma.done.wait [#allocation6], 4096  }
  0x25   :  { %962 = vsyncadd [#allocation6], 4294963200  ;;  %v970_v0 = vmov 0   ;;  %v971_v1 = vmov 2   ;;  %v972_v2 = vmov 0.0   ;;  %v1029_v3 = vld [vmem:[#allocation2] sm:$0xff]  ;;  %v62_v45 = vlaneseq }
  0x26   :  { %832 = vset.pattern.permute.xlu0 %v970_v0  ;;  %834 = vset.pattern.permute.xlu1 %v971_v1  ;;  %v82_v4 = vadd.s32 64, %v1029_v3  ;;  %v843_v5 = vld [vmem:[#allocation5 + $0x78] sm:$0xff]   ;;  %v72_v7 = vadd.s32 32, %v1029_v3  ;;  %v92_v8 = vadd.s32 96, %v1029_v3  ;;  %v973_v10 = vmov 1   ;;  %v846_v11 = vld [vmem:[#allocation5 + $0x70] sm:$0xff]  }
  0x27   :  { %764 = vmatprep.subr.bf16.mxu1 %v972_v2  ;;  %67 = vperm.xlu0 %832, %v1029_v3   ;;  %v844_v6 = vld [vmem:[#allocation5 + $0xb8] sm:$0xff]   ;;  %v102_v12 = vadd.s32 128, %v1029_v3  ;;  %v847_v13 = vld [vmem:[#allocation5 + $0xb0] sm:$0xff]   ;;  %v974_v14 = vmov 3   ;;  %v112_v15 = vadd.s32 160, %v1029_v3  ;;  %v975_v17 = vmov 5  }
  0x28   :  { %84 = vperm.xlu1 %834, %v82_v4   ;;  %724 = vmatprep.subr.bf16.mxu0 %v843_v5  ;;  %v845_v9 = vld [vmem:[#allocation5 + $0x38] sm:$0xff]   ;;  %v848_v16 = vld [vmem:[#allocation5 + $0x30] sm:$0xff]   ;;  %v849_v18 = vld [vmem:[#allocation5 + $0x68] sm:$0xff]   ;;  %v142_v20 = vadd.s32 256, %v1029_v3  ;;  %v976_v22 = vmov 4   ;;  %v122_v23 = vadd.s32 192, %v1029_v3 }
  0x29   :  { %765 = vmatpush3.bf16.msra.mxu1 %v844_v6  ;;  %725 = vmatpush3.bf16.msra.mxu0 %v845_v9  ;;  %v850_v19 = vld [vmem:[#allocation5 + $0xa8] sm:$0xff]   ;;  %v852_v24 = vld [vmem:[#allocation5 + $0x60] sm:$0xff]   ;;  %v977_v26 = vmov 8   ;;  %v978_v28 = vmov 6   ;;  %v855_v29 = vld [vmem:[#allocation5 + $0x58] sm:$0xff]   ;;  %v132_v31 = vadd.s32 224, %v1029_v3 }
  0x2a   :  { %766 = vmatprep.subr.bf16.mxu1 %v972_v2  ;;  %726 = vmatprep.subr.bf16.mxu0 %v846_v11  ;;  %v851_v21 = vld [vmem:[#allocation5 + $0x28] sm:$0xff]   ;;  %v853_v25 = vld [vmem:[#allocation5 + $0xa0] sm:$0xff]   ;;  %v856_v30 = vld [vmem:[#allocation5 + $0x98] sm:$0xff]   ;;  %v979_v36 = vmov 9   ;;  %v980_v37 = vmov 7   ;;  %v152_v38 = vadd.s32 288, %v1029_v3 }
  0x2b   :  { %833 = vset.pattern.permute.xlu0 %v973_v10  ;;  %v854_v27 = vld [vmem:[#allocation5 + $0x20] sm:$0xff]   ;;  %v857_v32 = vld [vmem:[#allocation5 + $0x18] sm:$0xff]   ;;  %v858_v33 = vld [vmem:[#allocation5 + $0x50] sm:$0xff]   ;;  %vm1131_vm0 = vmmov 0   ;;  %v1051_v46 = vand.u32 127, %v62_v45  ;;  %v1132_v56 = vmov 0 }
  0x2c   :  { %74 = vperm.xlu0 %833, %v72_v7   ;;  %835 = vset.pattern.permute.xlu1 %v974_v14  ;;  %v859_v34 = vld [vmem:[#allocation5 + $0x90] sm:$0xff]   ;;  %v861_v39 = vld [vmem:[#allocation5 + $0x48] sm:$0xff]   ;;  %v864_v42 = vld [vmem:[#allocation5 + $0x40] sm:$0xff]   ;;  %s988_s10 = smov [#allocation8]  }
  0x2d   :  { %94 = vperm.xlu1 %835, %v92_v8   ;;  %767 = vmatpush3.bf16.msra.mxu1 %v847_v13  ;;  %v860_v35 = vld [vmem:[#allocation5 + $0x10] sm:$0xff]   ;;  %v862_v40 = vld [vmem:[#allocation5 + $0x88] sm:$0xff]   ;;  %v865_v43 = vld [vmem:[#allocation5 + $0x80] sm:$0xff]   ;;  %v1054_v49 = vadd.s32 128, %v1051_v46  ;;  %v65_v50 = vadd.s32 256, %v1051_v46  ;;  %s673_s11 = sshll.u32 %s988_s10, 4  ;;  %s674_s11 = int_to_ptr.vmem [resolvable:$true] %s673_s11 }
  0x2e   :  { %727 = vmatpush3.bf16.msra.mxu0 %v848_v16  ;;  %768 = vmatprep.subr.bf16.mxu1 %v972_v2  ;;  %v863_v41 = vld [vmem:[#allocation5 + $0x8] sm:$0xff]   ;;  %v866_v44 = vld [vmem:[#allocation5] sm:$0xff]   ;;  %v867_v3 = vld [vmem:[#allocation7 + $0x38] sm:$0xff]   ;;  %s939_s12 = scalar_lea.vmem %s674_s11, 128  ;;  %p944_p2 = scmp.lt.s32.totalorder %s674_s11, %s674_s11 }
  0x2f   :  { %728 = vmatprep.subr.bf16.mxu0 %v849_v18  ;;  %780 = vmatprep.mubr.msk.bf16.mxu1 %vm1131_vm0, %v972_v2  ;;  %v868_v4 = vld [vmem:[#allocation7 + $0x30] sm:$0xff]   ;;  %v869_v5 = vld [vmem:[#allocation7 + $0x28] sm:$0xff]   ;;  %v870_v6 = vld [vmem:[#allocation7 + $0x20] sm:$0xff]   ;;  %p940_p1 = scmp.ne.s32.totalorder %s674_s11, %s939_s12  ;;  %p945_p3 = scmp.lt.s32.totalorder %s939_s12, %s939_s12 }
  0x30   :  { %837 = vset.pattern.permute.xlu0 %v975_v17  ;;  %v871_v7 = vld [vmem:[#allocation7 + $0x18] sm:$0xff]   ;;  %v872_v8 = vld [vmem:[#allocation7 + $0x10] sm:$0xff]   ;;  %v873_v9 = vld [vmem:[#allocation7 + $0x8] sm:$0xff]  }
  0x31   :  { %114 = vperm.xlu0 %837, %v112_v15   ;;  %836 = vset.pattern.permute.xlu1 %v976_v22  ;;  %v874_v10 = vld [vmem:[#allocation7] sm:$0xff]   ;;  %v686_v15 = vld [vmem:[%s1127_s2] ss:$0 sm:$0xff]  ;;  %p946_p4 = por %p945_p3, %p944_p2 }
  0x32   :  { %104 = vperm.xlu1 %836, %v102_v12   ;;  %769 = vmatpush3.bf16.msra.mxu1 %v850_v19 }
  0x33   :  { %729 = vmatpush3.bf16.msra.mxu0 %v851_v21  ;;  %770 = vmatprep.subr.bf16.mxu1 %v972_v2  ;;  %p947_p5 = pnand %p946_p4, %p940_p1 }
  0x34   :  { %730 = vmatprep.subr.bf16.mxu0 %v852_v24 }
  0x35   :  { %840 = vset.pattern.permute.xlu0 %v977_v26 }
  0x36   :  { %144 = vperm.xlu0 %840, %v142_v20   ;;  %838 = vset.pattern.permute.xlu1 %v978_v28 }
  0x37   :  { %771 = vmatpush3.bf16.msra.mxu1 %v853_v25  ;;  %124 = vperm.xlu1 %838, %v122_v23  }
  0x38   :  { %731 = vmatpush3.bf16.msra.mxu0 %v854_v27  ;;  %772 = vmatprep.subr.bf16.mxu1 %v972_v2 }
  0x39   :  { %732 = vmatprep.subr.bf16.mxu0 %v855_v29 }
  0x3a   :  { %842 = vset.pattern.permute.xlu0 %v979_v36 }
  0x3b   :  { %773 = vmatpush3.bf16.msra.mxu1 %v856_v30  ;;  %839 = vset.pattern.permute.xlu1 %v980_v37  ;;  %v984_v37 = vmov 2131351028  }
  0x3c   :  { %733 = vmatpush3.bf16.msra.mxu0 %v857_v32  ;;  %134 = vperm.xlu1 %839, %v132_v31   ;;  %v982_v32 = vmov 683565275  }
  0x3d   :  { %774 = vmatprep.subr.bf16.mxu1 %v972_v2  ;;  %734 = vmatprep.subr.bf16.mxu0 %v858_v33 }
  0x3f   :  { %775 = vmatpush3.bf16.msra.mxu1 %v859_v34  ;;  %v983_v34 = vmov 2475754826  }
  0x40   :  { %735 = vmatpush3.bf16.msra.mxu0 %v860_v35  ;;  %776 = vmatprep.subr.bf16.mxu1 %v972_v2 }
  0x41   :  { %841 = vset.pattern.permute.xlu1 %v979_v36  ;;  %736 = vmatprep.subr.bf16.mxu0 %v861_v39 }
  0x42   :  { %154 = vperm.xlu1 %841, %v152_v38  }
  0x43   :  { %777 = vmatpush3.bf16.msra.mxu1 %v862_v40  ;;  %v985_v40 = vmov 2102212464  }
  0x44   :  { %737 = vmatpush3.bf16.msra.mxu0 %v863_v41  ;;  %778 = vmatprep.subr.bf16.mxu1 %v972_v2 }
  0x45   :  { %738 = vmatprep.subr.bf16.mxu0 %v864_v42 }
  0x47   :  { %779 = vmatpush3.bf16.msra.mxu1 %v865_v43  ;;  %v986_v43 = vmov 920167782  }
  0x48   :  { %739 = vmatpush3.bf16.msra.mxu0 %v866_v44 }
  0x49   :  { %784 = vmatprep.subr.bf16.mxu0 %v972_v2 }
  0xa2   :  { %v68_v47 = vpop.permute.xlu0 %67 }
  0xa3   :  { %v85_v48 = vpop.permute.xlu1 %84  ;;  %vm69_vm1 = vcmp.eq.s32.totalorder %v1051_v46, %v68_v47  ;;  %vm70_vm2 = vcmp.eq.s32.totalorder %v1054_v49, %v68_v47  ;;  %vm71_vm3 = vcmp.eq.s32.totalorder %v65_v50, %v68_v47 }
  0xa4   :  { %vm86_vm9 = vcmp.eq.s32.totalorder %v1051_v46, %v85_v48  ;;  %vm87_vm11 = vcmp.eq.s32.totalorder %v1054_v49, %v85_v48  ;;  %vm88_vm14 = vcmp.eq.s32.totalorder %v65_v50, %v85_v48 }
  0xa7   :  { %v75_v51 = vpop.permute.xlu0 %74 }
  0xa8   :  { %vm76_vm4 = vcmp.eq.s32.totalorder %v1051_v46, %v75_v51  ;;  %vm77_vm5 = vcmp.eq.s32.totalorder %v1054_v49, %v75_v51  ;;  %vm78_vm6 = vcmp.eq.s32.totalorder %v65_v50, %v75_v51  ;;  %v95_v52 = vpop.permute.xlu1 %94 }
  0xa9   :  { %vm79_vm7 = vmor %vm69_vm1, %vm76_vm4  ;;  %vm96_vm13 = vcmp.eq.s32.totalorder %v1051_v46, %v95_v52  ;;  %vm97_vm0 = vcmp.eq.s32.totalorder %v1054_v49, %v95_v52  ;;  %vm98_vm4 = vcmp.eq.s32.totalorder %v65_v50, %v95_v52 }
  0xaa   :  { %vm80_vm8 = vmor %vm70_vm2, %vm77_vm5 }
  0xab   :  { %vm81_vm10 = vmor %vm71_vm3, %vm78_vm6 }
  0xac   :  { %vm89_vm12 = vmor %vm79_vm7, %vm86_vm9  ;;  %v115_v54 = vpop.permute.xlu0 %114 }
  0xad   :  { %vm90_vm15 = vmor %vm80_vm8, %vm87_vm11  ;;  %v105_v53 = vpop.permute.xlu1 %104  ;;  %vm116_vm11 = vcmp.eq.s32.totalorder %v1051_v46, %v115_v54 }
  0xae   :  { %vm91_vm1 = vmor %vm81_vm10, %vm88_vm14  ;;  %vm106_vm5 = vcmp.eq.s32.totalorder %v1051_v46, %v105_v53  ;;  %vm107_vm6 = vcmp.eq.s32.totalorder %v1054_v49, %v105_v53  ;;  %vm108_vm9 = vcmp.eq.s32.totalorder %v65_v50, %v105_v53  ;;  %vm117_vm14 = vcmp.eq.s32.totalorder %v1054_v49, %v115_v54 }
  0xaf   :  { %vm99_vm2 = vmor %vm89_vm12, %vm96_vm13  ;;  %vm118_vm13 = vcmp.eq.s32.totalorder %v65_v50, %v115_v54 }
  0xb0   :  { %vm100_vm3 = vmor %vm90_vm15, %vm97_vm0 }
  0xb1   :  { %vm101_vm7 = vmor %vm91_vm1, %vm98_vm4  ;;  %v145_v57 = vpop.permute.xlu0 %144 }
  0xb2   :  { %vm109_vm8 = vmor %vm99_vm2, %vm106_vm5  ;;  %v125_v55 = vpop.permute.xlu1 %124 }
  0xb3   :  { %vm110_vm10 = vmor %vm100_vm3, %vm107_vm6  ;;  %vm126_vm15 = vcmp.eq.s32.totalorder %v1051_v46, %v125_v55  ;;  %vm128_vm4 = vcmp.eq.s32.totalorder %v65_v50, %v125_v55 }
  0xb4   :  { %vm111_vm12 = vmor %vm101_vm7, %vm108_vm9  ;;  %vm146_vm9 = vcmp.eq.s32.totalorder %v1051_v46, %v145_v57 }
  0xb5   :  { %vm119_vm0 = vmor %vm109_vm8, %vm116_vm11  ;;  %vm148_vm11 = vcmp.eq.s32.totalorder %v65_v50, %v145_v57 }
  0xb6   :  { %vm1070_vm1 = vmor %vm110_vm10, %vm117_vm14  ;;  %vm127_vm10 = vcmp.eq.s32.totalorder %v1054_v49, %v125_v55 }
  0xb7   :  { %v1133_v56 = vsel %vm1070_vm1, 4294967295, %v1132_v56  ;;  %vm121_vm2 = vmor %vm111_vm12, %vm118_vm13  ;;  %v135_v58 = vpop.permute.xlu1 %134 }
  0xb8   :  { %vm129_vm5 = vmor %vm119_vm0, %vm126_vm15  ;;  %vm136_vm6 = vcmp.eq.s32.totalorder %v1051_v46, %v135_v58  ;;  %vm138_vm7 = vcmp.eq.s32.totalorder %v65_v50, %v135_v58  ;;  %vm137_vm13 = vcmp.eq.s32.totalorder %v1054_v49, %v135_v58 }
  0xb9   :  { %vm131_vm3 = vmor %vm121_vm2, %vm128_vm4  ;;  %vm1134_vm4 = vnez %v1133_v56 }
  0xba   :  { %vm139_vm8 = vmor %vm129_vm5, %vm136_vm6  ;;  %vm147_vm5 = vcmp.eq.s32.totalorder %v1054_v49, %v145_v57 }
  0xbb   :  { %vm141_vm14 = vmor %vm131_vm3, %vm138_vm7 }
  0xbc   :  { %vm149_vm1 = vmor %vm139_vm8, %vm146_vm9 }
  0xbd   :  { %vm151_vm12 = vmor %vm141_vm14, %vm148_vm11  ;;  %v155_v59 = vpop.permute.xlu1 %154 }
  0xbe   :  { %vm156_vm0 = vcmp.eq.s32.totalorder %v1051_v46, %v155_v59  ;;  %vm158_vm15 = vcmp.eq.s32.totalorder %v65_v50, %v155_v59  ;;  %vm130_vm2 = vmor %vm1134_vm4, %vm127_vm10  ;;  %vm157_vm3 = vcmp.eq.s32.totalorder %v1054_v49, %v155_v59  ;;  %v987_v46 = vmov 1326507024  }
  0xbf   :  { %vm159_vm6 = vmor %vm149_vm1, %vm156_vm0  ;;  %vm1135_vm1 = vmmov 0  }
  0xc0   :  { %vm161_vm7 = vmor %vm151_vm12, %vm158_vm15  ;;  %v683_v60 = vsel %vm159_vm6, 1.0, %v972_v2 }
  0xc1   :  { %v685_v61 = vsel %vm161_vm7, 1.0, %v972_v2  ;;  %vm140_vm9 = vmor %vm130_vm2, %vm137_vm13  ;;  %v168_v0 = vpack.c.bf16 %v683_v60, %v683_v60 }
  0xc2   :  { %vm150_vm8 = vmor %vm140_vm9, %vm147_vm5  ;;  %v170_v62 = vpack.c.bf16 %v685_v61, %v685_v61 }
  0xc3   :  { %vm160_vm11 = vmor %vm150_vm8, %vm157_vm3 }
  0xc4   :  { %v684_v63 = vsel %vm160_vm11, 1.0, %v972_v2  ;;  %781 = vmatmul.mubr.bf16.vlgmr.msra.gmra.mxu1 %v170_v62 }
  0xc5   :  { %v169_v1 = vpack.c.bf16 %v684_v63, %v684_v63 }
  0xc7   :  { %402 = vmatprep.mubr.bf16.mxu0 %v169_v1 }
  0xc8   :  { %403 = vmatmul.mubr.bf16.vlgmr.msra.gmra.mxu0 %v168_v0 }
  0xc9   :  { %800 = vmatprep.mubr.msk.bf16.mxu0 %vm1135_vm1, %v972_v2  ;;  %785 = vmatpush3.bf16.msra.mxu0 %v867_v3 }
  0xca   :  { %786 = vmatprep.subr.bf16.mxu0 %v972_v2 }
  0xcd   :  { %787 = vmatpush3.bf16.msra.mxu0 %v868_v4 }
  0xce   :  { %788 = vmatprep.subr.bf16.mxu0 %v972_v2 }
  0xd1   :  { %789 = vmatpush3.bf16.msra.mxu0 %v869_v5 }
  0xd2   :  { %790 = vmatprep.subr.bf16.mxu0 %v972_v2 }
  0xd5   :  { %791 = vmatpush3.bf16.msra.mxu0 %v870_v6 }
  0xd6   :  { %792 = vmatprep.subr.bf16.mxu0 %v972_v2 }
  0xd9   :  { %793 = vmatpush3.bf16.msra.mxu0 %v871_v7 }
  0xda   :  { %794 = vmatprep.subr.bf16.mxu0 %v972_v2 }
  0xdd   :  { %795 = vmatpush3.bf16.msra.mxu0 %v872_v8 }
  0xde   :  { %796 = vmatprep.subr.bf16.mxu0 %v972_v2 }
  0xe1   :  { %797 = vmatpush3.bf16.msra.mxu0 %v873_v9 }
  0xe2   :  { %798 = vmatprep.subr.bf16.mxu0 %v972_v2 }
  0xe5   :  { %799 = vmatpush3.bf16.msra.mxu0 %v874_v10 }
 0x184   :  { %v444_v11 = vpop.f32.mrf.mxu1 }
 0x186   :  { %v782_v12 = vpop.f32.mrf.mxu1 }
 0x188   :  { %v740_v13 = vpop.f32.mrf.mxu0  ;;  %v447_v14 = vpop.f32.mrf.mxu1 }
 0x18a   :  { %v741_v16 = vpop.f32.mrf.mxu0  ;;  %v783_v17 = vpop.f32.mrf.mxu1 }
 0x18b   :  { %v742_v18 = vadd.f32 %v741_v16, %v740_v13 }
 0x18c   :  { %v743_v19 = vpop.f32.mrf.mxu0 }
 0x18d   :  { %v405_v20 = vadd.f32 %v742_v18, %v686_v15 }
 0x18e   :  { %v744_v21 = vpop.f32.mrf.mxu0 }
 0x18f   :  { %v1098_v22 = vadd.f32 %v444_v11, %v405_v20 }
 0x191   :  { %v453_v23 = vand.u32 2139095040, %v1098_v22  ;;  %v450_v26 = vand.u32 2147483647, %v1098_v22  ;;  %vm452_vm2 = vcmp.lt.s32.totalorder %v1098_v22, 0  ;;  %vm542_vm9 = vweird.f32 %v1098_v22 }
 0x193   :  { %v454_v2 = vshrl.u32 %v453_v23, 23  ;;  %v457_v29 = vand.u32 8388607, %v450_v26  ;;  %vm451_vm5 = vcmp.le.f32.partialorder %v450_v26, 0.7853982 }
 0x195   :  { %v711_v24 = vadd.s32 4294967169, %v454_v2  ;;  %v458_v48 = vor.u32 8388608, %v457_v29 }
 0x197   :  { %v460_v25 = vadd.s32 1, %v711_v24  ;;  %v498_v62 = vshll.u32 %v458_v48, 8 }
 0x199   :  { %vm461_vm10 = vcmp.gt.s32.totalorder %v460_v25, 0 }
 0x19a   :  { %v462_v27 = vsel %vm461_vm10, %v460_v25, 0 }
 0x19b   :  { %v464_v28 = vand.u32 31, %v462_v27  ;;  %v463_v31 = vshrl.u32 %v462_v27, 5 }
 0x19d   :  { %v465_v30 = vsub.s32 32, %v464_v28  ;;  %v467_v33 = vshll.u32 %v982_v32, %v464_v28  ;;  %v470_v35 = vshll.u32 %v983_v34, %v464_v28  ;;  %v473_v39 = vshll.u32 %v984_v37, %v464_v28 }
 0x19e   :  { %v476_v42 = vshll.u32 %v985_v40, %v464_v28  ;;  %v479_v45 = vshll.u32 %v986_v43, %v464_v28  ;;  %vm482_vm14 = vcmp.lt.s32.totalorder %v463_v31, 1  ;;  %vm485_vm12 = vcmp.lt.s32.totalorder %v463_v31, 4 }
 0x19f   :  { %v468_v36 = vshrl.u32 %v983_v34, %v465_v30  ;;  %v471_v38 = vshrl.u32 %v984_v37, %v465_v30  ;;  %v474_v41 = vshrl.u32 %v985_v40, %v465_v30  ;;  %v477_v44 = vshrl.u32 %v986_v43, %v465_v30 }
 0x1a0   :  { %v480_v47 = vshrl.u32 %v987_v46, %v465_v30  ;;  %v466_v57 = vshrl.u32 %v982_v32, %v465_v30  ;;  %vm484_vm13 = vcmp.lt.s32.totalorder %v463_v31, 3  ;;  %vm483_vm0 = vcmp.lt.s32.totalorder %v463_v31, 2 }
 0x1a1   :  { %v469_v49 = vor.u32 %v468_v36, %v467_v33  ;;  %v472_v50 = vor.u32 %v471_v38, %v470_v35  ;;  %v475_v51 = vor.u32 %v474_v41, %v473_v39  ;;  %v478_v52 = vor.u32 %v477_v44, %v476_v42 }
 0x1a2   :  { %v481_v53 = vor.u32 %v480_v47, %v479_v45 }
 0x1a3   :  { %v487_v54 = vsel %vm485_vm12, %v475_v51, 2102212464  ;;  %v490_v55 = vsel %vm482_vm14, %v469_v49, %v472_v50  ;;  %v494_v56 = vsel %vm482_vm14, %v472_v50, %v475_v51  ;;  %v491_v58 = vsel %vm485_vm12, %v478_v52, 920167782 }
 0x1a4   :  { %v495_v59 = vsel %vm485_vm12, %v481_v53, 1326507024  ;;  %v492_v60 = vsel %vm484_vm13, %v475_v51, %v491_v58  ;;  %v486_v63 = vsel %vm482_vm14, %v466_v57, %v469_v49  ;;  %v488_v0 = vsel %vm484_vm13, %v472_v50, %v487_v54  ;;  %v715_v51 = vld [vmem:[%s1129_s4] ss:$0 sm:$0xff] }
 0x1a5   :  { %v496_v61 = vsel %vm484_vm13, %v478_v52, %v495_v59  ;;  %v493_v1 = vsel %vm483_vm0, %v490_v55, %v492_v60  ;;  %v489_v8 = vsel %vm483_vm0, %v486_v63, %v488_v0 }
 0x1a6   :  { %v497_v3 = vsel %vm483_vm0, %v494_v56, %v496_v61  ;;  %v1107_v6 = vmul.u32.u64.low %v498_v62, %v493_v1  ;;  %v1108_v7 = vmul.u32.u64.high %v498_v62, %v493_v1, %v1107_v6  ;;  %v505_v10 = vmul.u32 %v498_v62, %v489_v8 }
 0x1a7   :  { %v1104_v4 = vmul.u32.u64.low %v498_v62, %v497_v3  ;;  %v1105_v5 = vmul.u32.u64.high %v498_v62, %v497_v3, %v1104_v4 }
 0x1a8   :  { %v508_v9 = vadd.s32 1, %v1108_v7 }
 0x1a9   :  { %vm507_vm15 = vc.u32 %v1105_v5, %v1107_v6  ;;  %v506_v23 = vadd.s32 %v1107_v6, %v1105_v5 }
 0x1aa   :  { %v509_v11 = vsel %vm507_vm15, %v508_v9, %v1108_v7 }
 0x1ab   :  { %v510_v12 = vadd.s32 %v509_v11, %v505_v10 }
 0x1ad   :  { %v511_v13 = vadd.s32 536870912, %v510_v12 }
 0x1af   :  { %v512_v14 = vshrl.u32 %v511_v13, 30 }
 0x1b1   :  { %v513_v15 = vshll.u32 %v512_v14, 30  ;;  %v536_v36 = vsub.s32 4, %v512_v14 }
 0x1b3   :  { %v514_v16 = vsub.s32 %v510_v12, %v513_v15  ;;  %v537_v39 = vsel %vm452_vm2, %v536_v36, %v512_v14 }
 0x1b4   :  { %v539_v40 = vsel %vm451_vm5, 0, %v537_v39 }
 0x1b5   :  { %v516_v17 = vsub.s32 0, %v514_v16  ;;  %v543_v41 = vadd.s32 3, %v539_v40 }
 0x1b7   :  { %v712_v18 = vmin.u32 %v516_v17, %v514_v16  ;;  %v544_v42 = vand.u32 3, %v543_v41 }
 0x1b9   :  { %v518_v19 = vclz %v712_v18  ;;  %vm549_vm6 = vcmp.eq.s32.totalorder %v544_v42, 2  ;;  %vm546_vm3 = vcmp.eq.s32.totalorder %v544_v42, 0  ;;  %vm545_vm7 = vcmp.lt.s32.totalorder %v544_v42, 2 }
 0x1bb   :  { %v713_v20 = vadd.s32 4294967294, %v518_v19 }
 0x1bd   :  { %vm714_vm4 = vcmp.lt.s32.totalorder %v713_v20, 0 }
 0x1be   :  { %v521_v21 = vsel %vm714_vm4, 0, %v713_v20 }
 0x1bf   :  { %v522_v2 = vsub.s32 32, %v521_v21  ;;  %v526_v24 = vsub.s32 4294967266, %v521_v21  ;;  %v523_v25 = vshll.u32 %v514_v16, %v521_v21 }
 0x1c1   :  { %v524_v27 = vshrl.u32 %v506_v23, %v522_v2  ;;  %v527_v28 = vadd.s32 127, %v526_v24 }
 0x1c3   :  { %v525_v29 = vor.u32 %v524_v27, %v523_v25  ;;  %v528_v30 = vshll.u32 %v527_v28, 23 }
 0x1c5   :  { %v529_v31 = vor.u32 4788187, %v528_v30  ;;  %v532_v33 = vcvt.s32.f32 %v525_v29 }
 0x1c7   :  { %v530_v32 = vand.u32 2147483647, %v529_v31 }
 0x1c9   :  { %v533_v34 = vmul.f32 %v532_v33, %v530_v32 }
 0x1cb   :  { %v534_v35 = vxor.u32 2147483648, %v533_v34 }
 0x1cd   :  { %v535_v37 = vsel %vm452_vm2, %v534_v35, %v533_v34 }
 0x1ce   :  { %v538_v38 = vsel %vm451_vm5, %v1098_v22, %v535_v37 }
 0x1cf   :  { %875 = vcosq.f32 %v538_v38 }
 0x1d0   :  { %877 = vsinq.f32 %v538_v38 }
 0x1dc   :  { %v876_v43 = vpop.eup %875 }
 0x1dd   :  { %v878_v44 = vpop.eup %877  ;;  %v550_v45 = vxor.u32 2147483648, %v876_v43 }
 0x1de   :  { %v547_v46 = vxor.u32 2147483648, %v878_v44 }
 0x1df   :  { %v551_v47 = vsel %vm549_vm6, %v550_v45, %v878_v44 }
 0x1e0   :  { %v548_v48 = vsel %vm546_vm3, %v876_v43, %v547_v46 }
 0x1e1   :  { %v552_v26 = vsel %vm545_vm7, %v548_v48, %v551_v47 }
 0x1e2   :  { %v553_v49 = vsel %vm542_vm9, nan, %v552_v26 }
 0x1e3   :  { %v554_v50 = vpack.c.bf16 %v553_v49, %v553_v49 }
 0x1e5   :  { %801 = vmatmul.mubr.bf16.vlgmr.msra.gmra.mxu0 %v554_v50 }
 0x2a5   :  { %v660_v52 = vpop.f32.mrf.mxu0 }
 0x2a6   :  { %v661_v53 = vadd.f32 %v715_v51, %v660_v52 }
 0x2a7   :  { %v802_v54 = vpop.f32.mrf.mxu0 }
 0x2a8   :  { %666 = vst [vmem:[#allocation8] sm:$0xff] %v661_v53 }
 0x2a9   :  { %v663_v55 = vpop.f32.mrf.mxu0 }
 0x2aa   :  { %950 = shalt.err (!%p947_p5)
}
 0x2ab   :  { %676 = dma.vmem_to_hbm [thread:$0]  %s674_s11, 128, %s1130_s5, [#allocation4]   ;;  %v803_v22 = vpop.f32.mrf.mxu0 }
 0x2ac   :  { %963 = dma.done.wait [#allocation4], 128  }
 0x2ad   :  { %964 = vsyncadd [#allocation4], 4294967168 }
 0x2ae   :  { %680 = vsyncpa [#allocation3], 1 }
 0x2af   :  { %681 = vsyncpa [#allocation6], 1 }
 0x2b0   :  { %682 = vsyncpa [#allocation4], 1 }

</bundles_post_ra>
